<compile_context>
chip_gen: v7x
topology: tpu7x:2x2x1
jax: 0.10.0
libtpu: 0.0.40
codegen_flags: <defaults>
</compile_context>

<pallas_src>
import jax
import jax.numpy as jnp
from jax.experimental import pallas as pl
from jax.experimental.pallas import tpu as pltpu

_LANES = 128


def _round_up(x, m):
    return ((x + m - 1) // m) * m


def criterion_parallel_forward(mask, output, gt, *,
                               max_block_rows=4096,
                               parallel_chunks=4):
    """Returns {"valid": scalar, "hole": scalar} matching CriterionParallel.forward."""
    assert output.shape == gt.shape == mask.shape
    n_elems = 1
    for d in output.shape:
        n_elems *= d

    rows = pl.cdiv(n_elems, _LANES)
    # Pad only when strictly necessary (non-lane-divisible sizes or tiny inputs);
    # the common case is a free reshape with zero extra HBM passes.
    if (n_elems % _LANES != 0) or (rows % 8 != 0):
        rows_arr = _round_up(max(rows, 8), 8)
    else:
        rows_arr = rows
    padded = rows_arr * _LANES

    max_block_rows = max(8, (max_block_rows // 8) * 8)
    tr = min(max_block_rows, rows_arr)            # block rows (multiple of 8)
    nb = pl.cdiv(rows_arr, tr)                    # total row-blocks
    p_chunks = max(1, min(parallel_chunks, nb))   # outer parallel chunks
    n_inner = pl.cdiv(nb, p_chunks)               # inner reduction steps per chunk
    mask_tail = (rows_arr % tr) != 0              # last block is partial

    def to_tiles(x):
        flat = x.reshape(-1)
        if padded != n_elems:
            # Zero padding contributes 0 to both sums (|0-0| * anything == 0).
            flat = jnp.pad(flat, (0, padded - n_elems))
        return flat.reshape(rows_arr, _LANES)

    mask_t = to_tiles(mask)   # f32 straight through (no int8 round-trip)
    pred_t = to_tiles(output)
    gt_t = to_tiles(gt)

    def kernel(mask_ref, pred_ref, gt_ref, vsum_ref, tsum_ref):
        j = pl.program_id(1)
        b = pl.program_id(0) * n_inner + j        # linear row-block index

        # Unconditional init so chunks with no valid blocks still emit zeros.
        @pl.when(j == 0)
        def _():
            vsum_ref[...] = jnp.zeros_like(vsum_ref)
            tsum_ref[...] = jnp.zeros_like(tsum_ref)

        # Skip duplicated (clamped) blocks beyond the last real one.
        @pl.when(b < nb)
        def _():
            raw = jnp.abs(pred_ref[...].astype(jnp.float32)
                          - gt_ref[...].astype(jnp.float32))
            m = mask_ref[...].astype(jnp.float32)
            if mask_tail:
                # Rows past rows_arr in the partial last block are unspecified
                # VMEM data; mask both streams (a select discards NaN/Inf).
                row = (jax.lax.broadcasted_iota(jnp.int32, (tr, _LANES), 0)
                       + b * tr)
                keep = row < rows_arr
                diff = jnp.where(keep, raw, 0.0)
                mdiff = jnp.where(keep, m * raw, 0.0)
            else:
                diff = raw
                mdiff = m * raw
            # Accumulate into lane-dense (8, 128) partial-sum tiles (no per-step
            # cross-lane reduce-to-scalar; better f32 accumulation).
            tsum_ref[...] += diff.reshape(tr // 8, 8, _LANES).sum(axis=0)[None]
            vsum_ref[...] += mdiff.reshape(tr // 8, 8, _LANES).sum(axis=0)[None]

    in_spec = pl.BlockSpec(
        (tr, _LANES),
        lambda p, j: (jnp.minimum(p * n_inner + j, nb - 1), 0))
    out_spec = pl.BlockSpec((1, 8, _LANES), lambda p, j: (p, 0, 0))

    bytes_accessed = 3 * padded * 4 + 2 * p_chunks * 8 * _LANES * 4
    cost = pl.CostEstimate(flops=6 * padded, transcendentals=0,
                           bytes_accessed=bytes_accessed)

    vsum, tsum = pl.pallas_call(
        kernel,
        grid=(p_chunks, n_inner),
        in_specs=[in_spec, in_spec, in_spec],
        out_specs=(out_spec, out_spec),
        out_shape=(jax.ShapeDtypeStruct((p_chunks, 8, _LANES), jnp.float32),
                   jax.ShapeDtypeStruct((p_chunks, 8, _LANES), jnp.float32)),
        compiler_params=pltpu.CompilerParams(
            dimension_semantics=("parallel", "arbitrary"),
            vmem_limit_bytes=32 * 1024 * 1024),
        cost_estimate=cost,
    )(mask_t, pred_t, gt_t)

    # CriterionParallel's mean-of-per-replica-means == global mean for equal
    # shards; apply the single 1/(B*C*H*W) scale once here.
    inv = 1.0 / float(n_elems)
    valid_sum = jnp.sum(vsum)
    total_sum = jnp.sum(tsum)
    return {
        "valid": valid_sum * inv,
        # mask in [0, 1]: (1 - mask) * |diff| == |diff| - mask * |diff| exactly.
        "hole": (total_sum - valid_sum) * inv,
    }


# ---------------------------------------------------------------------------
# Pure-JAX reference and smoke tests.
# ---------------------------------------------------------------------------
def _reference(mask, output, gt):
    diff = jnp.abs(output - gt)
    return {"valid": jnp.mean(mask * diff),
            "hole": jnp.mean((1.0 - mask) * diff)}


def _check(shape, key, **kw):
    k1, k2, k3 = jax.random.split(key, 3)
    output = jax.random.normal(k1, shape, dtype=jnp.float32)
    gt = jax.random.normal(k2, shape, dtype=jnp.float32)
    mask = (jax.random.uniform(k3, shape) > 0.3).astype(jnp.float32)
    got = criterion_parallel_forward(mask, output, gt, **kw)
    got = jax.tree_util.tree_map(jax.block_until_ready, got)
    ref = _reference(mask, output, gt)
    for k in ref:
        assert jnp.allclose(got[k], ref[k], rtol=1e-5, atol=1e-5), (
            k, got[k], ref[k], shape, kw)


if __name__ == "__main__":
    key = jax.random.PRNGKey(0)
    k0, k1, k2 = jax.random.split(key, 3)
    # Primary smoke test at the module's typical (B, C, H, W) shape.
    _check((2, 4, 16, 16), k0)
    # Non-lane-divisible shape with a small block: exercises the minimal pad,
    # partial-last-block row masking, and the multi-chunk parallel axis.
    _check((2, 3, 40, 50), k1, max_block_rows=40)
    # Same shape, block size chosen so grid over-covers: exercises the clamped /
    # skipped block path.
    _check((2, 3, 40, 50), k2, max_block_rows=16)
    print("KERNEL_OK")
</pallas_src>

<mosaic_0001>
module attributes {stable_mosaic.version = 11 : i64} {
  func.func @kernel(%arg0: i32, %arg1: i32, %arg2: memref<16x128xf32, #tpu.memory_space<vmem>>, %arg3: memref<16x128xf32, #tpu.memory_space<vmem>>, %arg4: memref<16x128xf32, #tpu.memory_space<vmem>>, %arg5: memref<1x8x128xf32, #tpu.memory_space<vmem>>, %arg6: memref<1x8x128xf32, #tpu.memory_space<vmem>>) attributes {dimension_semantics = [#tpu.dimension_semantics<parallel>, #tpu.dimension_semantics<arbitrary>], iteration_bounds = array<i64: 1, 1>, scalar_prefetch = 0 : i64, scratch_operands = 0 : i64, tpu.core_type = #tpu.core_type<tc>, window_params = [{transform_indices = @transform_0, window_bounds = array<i64: 16, 128>}, {transform_indices = @transform_1, window_bounds = array<i64: 16, 128>}, {transform_indices = @transform_2, window_bounds = array<i64: 16, 128>}, {transform_indices = @transform_3, window_bounds = array<i64: 1, 8, 128>}, {transform_indices = @transform_4, window_bounds = array<i64: 1, 8, 128>}]} {
    %c1_i32 = arith.constant 1 : i32
    %0 = arith.muli %arg0, %c1_i32 : i32
    %1 = arith.addi %0, %arg1 : i32
    %c0_i32 = arith.constant 0 : i32
    %2 = arith.cmpi eq, %arg1, %c0_i32 : i32
    %3 = arith.extui %2 : i1 to i32
    %c0_i32_0 = arith.constant 0 : i32
    %4 = arith.cmpi ne, %3, %c0_i32_0 : i32
    scf.if %4 {
      %cst = arith.constant 0.000000e+00 : f32
      %8 = vector.broadcast %cst : f32 to vector<1x8x128xf32>
      %c0 = arith.constant 0 : index
      %c0_3 = arith.constant 0 : index
      %c0_4 = arith.constant 0 : index
      %9 = vector.load %arg5[%c0, %c0_3, %c0_4] : memref<1x8x128xf32, #tpu.memory_space<vmem>>, vector<1x8x128xf32>
      tpu.vector_store %arg5[%c0, %c0_3, %c0_4], %8 {strides = array<i32>} : memref<1x8x128xf32, #tpu.memory_space<vmem>>, vector<1x8x128xf32>,
      %cst_5 = arith.constant 0.000000e+00 : f32
      %10 = vector.broadcast %cst_5 : f32 to vector<1x8x128xf32>
      %c0_6 = arith.constant 0 : index
      %c0_7 = arith.constant 0 : index
      %c0_8 = arith.constant 0 : index
      %11 = vector.load %arg6[%c0_6, %c0_7, %c0_8] : memref<1x8x128xf32, #tpu.memory_space<vmem>>, vector<1x8x128xf32>
      tpu.vector_store %arg6[%c0_6, %c0_7, %c0_8], %10 {strides = array<i32>} : memref<1x8x128xf32, #tpu.memory_space<vmem>>, vector<1x8x128xf32>,
    } else {
    }
    %c1_i32_1 = arith.constant 1 : i32
    %5 = arith.cmpi slt, %1, %c1_i32_1 : i32
    %6 = arith.extui %5 : i1 to i32
    %c0_i32_2 = arith.constant 0 : i32
    %7 = arith.cmpi ne, %6, %c0_i32_2 : i32
    scf.if %7 {
      %c0 = arith.constant 0 : index
      %c0_3 = arith.constant 0 : index
      %8 = vector.load %arg3[%c0, %c0_3] : memref<16x128xf32, #tpu.memory_space<vmem>>, vector<16x128xf32>
      %c0_4 = arith.constant 0 : index
      %c0_5 = arith.constant 0 : index
      %9 = vector.load %arg4[%c0_4, %c0_5] : memref<16x128xf32, #tpu.memory_space<vmem>>, vector<16x128xf32>
      %10 = arith.subf %8, %9 : vector<16x128xf32>
      %11 = math.absf %10 : vector<16x128xf32>
      %c0_6 = arith.constant 0 : index
      %c0_7 = arith.constant 0 : index
      %12 = vector.load %arg2[%c0_6, %c0_7] : memref<16x128xf32, #tpu.memory_space<vmem>>, vector<16x128xf32>
      %13 = arith.mulf %12, %11 : vector<16x128xf32>
      %c0_8 = arith.constant 0 : index
      %c0_9 = arith.constant 0 : index
      %c0_10 = arith.constant 0 : index
      %14 = vector.load %arg6[%c0_8, %c0_9, %c0_10] : memref<1x8x128xf32, #tpu.memory_space<vmem>>, vector<1x8x128xf32>
      %15 = vector.shape_cast %11 : vector<16x128xf32> to vector<2x8x128xf32>
      %cst = arith.constant dense<0.000000e+00> : vector<8x128xf32>
      %16 = vector.multi_reduction <add>, %15, %cst [0] : vector<2x8x128xf32> to vector<8x128xf32>
      %17 = vector.shape_cast %16 : vector<8x128xf32> to vector<1x8x128xf32>
      %18 = arith.addf %14, %17 : vector<1x8x128xf32>
      %c0_11 = arith.constant 0 : index
      %c0_12 = arith.constant 0 : index
      %c0_13 = arith.constant 0 : index
      %19 = vector.load %arg6[%c0_11, %c0_12, %c0_13] : memref<1x8x128xf32, #tpu.memory_space<vmem>>, vector<1x8x128xf32>
      tpu.vector_store %arg6[%c0_11, %c0_12, %c0_13], %18 {strides = array<i32>} : memref<1x8x128xf32, #tpu.memory_space<vmem>>, vector<1x8x128xf32>,
      %c0_14 = arith.constant 0 : index
      %c0_15 = arith.constant 0 : index
      %c0_16 = arith.constant 0 : index
      %20 = vector.load %arg5[%c0_14, %c0_15, %c0_16] : memref<1x8x128xf32, #tpu.memory_space<vmem>>, vector<1x8x128xf32>
      %21 = vector.shape_cast %13 : vector<16x128xf32> to vector<2x8x128xf32>
      %cst_17 = arith.constant dense<0.000000e+00> : vector<8x128xf32>
      %22 = vector.multi_reduction <add>, %21, %cst_17 [0] : vector<2x8x128xf32> to vector<8x128xf32>
      %23 = vector.shape_cast %22 : vector<8x128xf32> to vector<1x8x128xf32>
      %24 = arith.addf %20, %23 : vector<1x8x128xf32>
      %c0_18 = arith.constant 0 : index
      %c0_19 = arith.constant 0 : index
      %c0_20 = arith.constant 0 : index
      %25 = vector.load %arg5[%c0_18, %c0_19, %c0_20] : memref<1x8x128xf32, #tpu.memory_space<vmem>>, vector<1x8x128xf32>
      tpu.vector_store %arg5[%c0_18, %c0_19, %c0_20], %24 {strides = array<i32>} : memref<1x8x128xf32, #tpu.memory_space<vmem>>, vector<1x8x128xf32>,
    } else {
    }
    return
  }
  func.func @transform_0(%arg0: i32, %arg1: i32) -> (i32, i32) {
    %c1_i32 = arith.constant 1 : i32
    %0 = arith.muli %arg0, %c1_i32 : i32
    %1 = arith.addi %0, %arg1 : i32
    %c0_i32 = arith.constant 0 : i32
    %2 = arith.minsi %1, %c0_i32 : i32
    %c0_i32_0 = arith.constant 0 : i32
    %c0_i32_1 = arith.constant 0 : i32
    return %2, %c0_i32_0 : i32, i32
  }
  func.func @transform_1(%arg0: i32, %arg1: i32) -> (i32, i32) {
    %c1_i32 = arith.constant 1 : i32
    %0 = arith.muli %arg0, %c1_i32 : i32
    %1 = arith.addi %0, %arg1 : i32
    %c0_i32 = arith.constant 0 : i32
    %2 = arith.minsi %1, %c0_i32 : i32
    %c0_i32_0 = arith.constant 0 : i32
    %c0_i32_1 = arith.constant 0 : i32
    return %2, %c0_i32_0 : i32, i32
  }
  func.func @transform_2(%arg0: i32, %arg1: i32) -> (i32, i32) {
    %c1_i32 = arith.constant 1 : i32
    %0 = arith.muli %arg0, %c1_i32 : i32
    %1 = arith.addi %0, %arg1 : i32
    %c0_i32 = arith.constant 0 : i32
    %2 = arith.minsi %1, %c0_i32 : i32
    %c0_i32_0 = arith.constant 0 : i32
    %c0_i32_1 = arith.constant 0 : i32
    return %2, %c0_i32_0 : i32, i32
  }
  func.func @transform_3(%arg0: i32, %arg1: i32) -> (i32, i32, i32) {
    %c0_i32 = arith.constant 0 : i32
    %c0_i32_0 = arith.constant 0 : i32
    %c0_i32_1 = arith.constant 0 : i32
    return %arg0, %c0_i32, %c0_i32_0 : i32, i32, i32
  }
  func.func @transform_4(%arg0: i32, %arg1: i32) -> (i32, i32, i32) {
    %c0_i32 = arith.constant 0 : i32
    %c0_i32_0 = arith.constant 0 : i32
    %c0_i32_1 = arith.constant 0 : i32
    return %arg0, %c0_i32, %c0_i32_0 : i32, i32, i32
  }
}

</mosaic_0001>

<bundles_post_ra>
// kernel: tpu_custom_call.1
= control target key start
LH: loop header
LB: loop body
LE: loop exit
PB: predicated region body
PF: predicated region fallthrough
CT: control target
= control target key end

     0   :  { %10 = vsyncpa [#allocation3], 0  ;;  %s390_s0 = inlined_call_operand.hbm [shape: f32[16,128], index: 0, kind: input, shape index: {}]   ;;  %s391_s1 = inlined_call_operand.hbm [shape: f32[16,128], index: 1, kind: input, shape index: {}]   ;;  %s392_s2 = inlined_call_operand.hbm [shape: f32[16,128], index: 2, kind: input, shape index: {}]   ;;  %s393_s3 = inlined_call_operand.hbm [shape: f32[1,8,128], index: 3, kind: output, shape index: {0}]   ;;  %s394_s4 = inlined_call_operand.hbm [shape: f32[1,8,128], index: 4, kind: output, shape index: {1}]  }
   0x1   :  { %11 = vsyncpa [#allocation6], 0 }
   0x2   :  { %12 = vsyncpa [#allocation4], 0 }
   0x3   :  { %13 = vsyncpa [#allocation10], 0  ;;  %s282_s15 = smov [#allocation5]   ;;  %s283_s17 = smov [#allocation2]  }
   0x4   :  { %s43_s16 = sshll.u32 %s282_s15, 4  ;;  %s25_s18 = sshll.u32 %s283_s17, 4  ;;  %s44_s16 = int_to_ptr.vmem [resolvable:$true] %s43_s16  ;;  %s314_s18 = int_to_ptr.vmem [resolvable:$true] %s25_s18 }
   0x5   :  { %s164_s21 = scalar_lea.hbm %s391_s1, 256 }
   0x6   :  { %p165_p0 = scmp.ne.s32.totalorder %s391_s1, %s164_s21  ;;  %p168_p1 = scmp.lt.u32.totalorder %s164_s21, %s391_s1 }
   0x8   :  { %p170_p2 = pnand %p168_p1, %p165_p0 }
   0xa   :  { %173 = shalt.err (!%p170_p2)
}
   0xb   :  { %s174_s26 = scalar_lea.vmem %s44_s16, 256  ;;  %p179_p4 = scmp.lt.s32.totalorder %s44_s16, %s44_s16 }
   0xc   :  { %p175_p3 = scmp.ne.s32.totalorder %s44_s16, %s174_s26  ;;  %p180_p5 = scmp.lt.s32.totalorder %s174_s26, %s174_s26 }
   0xe   :  { %p181_p6 = por %p180_p5, %p179_p4 }
  0x10   :  { %p182_p7 = pnand %p181_p6, %p175_p3 }
  0x12   :  { %185 = shalt.err (!%p182_p7)
}
  0x13   :  { %s284_s27 = smov 128   ;;  %s285_s28 = smov 8  }
  0x14   :  { %49 = dma.hbm_to_vmem [thread:$0]  %s391_s1, 256, %s44_s16, [#allocation6], %s284_s27, %s284_s27, %s285_s28  }
  0x15   :  { %s186_s7 = scalar_lea.hbm %s390_s0, 256 }
  0x16   :  { %p187_p8 = scmp.ne.s32.totalorder %s390_s0, %s186_s7  ;;  %p190_p9 = scmp.lt.u32.totalorder %s186_s7, %s390_s0 }
  0x18   :  { %p192_p10 = pnand %p190_p9, %p187_p8 }
  0x1a   :  { %195 = shalt.err (!%p192_p10)
}
  0x1b   :  { %s196_s12 = scalar_lea.vmem %s314_s18, 256  ;;  %p201_p12 = scmp.lt.s32.totalorder %s314_s18, %s314_s18 }
  0x1c   :  { %p197_p11 = scmp.ne.s32.totalorder %s314_s18, %s196_s12  ;;  %p202_p13 = scmp.lt.s32.totalorder %s196_s12, %s196_s12 }
  0x1e   :  { %p203_p0 = por %p202_p13, %p201_p12 }
  0x20   :  { %p204_p1 = pnand %p203_p0, %p197_p11 }
  0x22   :  { %207 = shalt.err (!%p204_p1)
}
  0x23   :  { %31 = dma.hbm_to_vmem [thread:$0]  %s390_s0, 256, %s314_s18, [#allocation3], %s284_s27, %s284_s27, %s285_s28  }
  0x24   :  { %s286_s14 = smov [#allocation7]   ;;  %s208_s19 = scalar_lea.hbm %s392_s2, 256 }
  0x25   :  { %s61_s15 = sshll.u32 %s286_s14, 4  ;;  %p209_p2 = scmp.ne.s32.totalorder %s392_s2, %s208_s19  ;;  %s62_s15 = int_to_ptr.vmem [resolvable:$true] %s61_s15 }
  0x26   :  { %p212_p3 = scmp.lt.u32.totalorder %s208_s19, %s392_s2 }
  0x28   :  { %p214_p4 = pnand %p212_p3, %p209_p2 }
  0x2a   :  { %217 = shalt.err (!%p214_p4)
}
  0x2b   :  { %s218_s24 = scalar_lea.vmem %s62_s15, 256  ;;  %p223_p6 = scmp.lt.s32.totalorder %s62_s15, %s62_s15 }
  0x2c   :  { %p219_p5 = scmp.ne.s32.totalorder %s62_s15, %s218_s24  ;;  %p224_p7 = scmp.lt.s32.totalorder %s218_s24, %s218_s24 }
  0x2e   :  { %p225_p8 = por %p224_p7, %p223_p6 }
  0x30   :  { %p226_p9 = pnand %p225_p8, %p219_p5 }
  0x32   :  { %229 = shalt.err (!%p226_p9)
}
  0x33   :  { %67 = dma.hbm_to_vmem [thread:$0]  %s392_s2, 256, %s62_s15, [#allocation6], %s284_s27, %s284_s27, %s285_s28  }
  0x34   :  { %274 = dma.done.wait [#allocation3], 256  }
  0x35   :  { %275 = vsyncadd [#allocation3], 4294967040 }
  0x36   :  { %276 = dma.done.wait [#allocation6], 512  }
  0x37   :  { %277 = vsyncadd [#allocation6], 4294966784  ;;  %v100_v0 = vld [vmem:[#allocation5] sm:$0xff]  ;;  %v101_v1 = vld [vmem:[#allocation5 + $0x8] sm:$0xff]  ;;  %s287_s25 = smov [#allocation9]   ;;  %s288_s2 = smov [#allocation8]  }
  0x38   :  { %v102_v2 = vld [vmem:[#allocation7] sm:$0xff]  ;;  %v103_v3 = vld [vmem:[#allocation7 + $0x8] sm:$0xff]  ;;  %s136_s26 = sshll.u32 %s287_s25, 4  ;;  %s126_s27 = sshll.u32 %s288_s2, 4  ;;  %s137_s26 = int_to_ptr.vmem [resolvable:$true] %s136_s26  ;;  %s127_s27 = int_to_ptr.vmem [resolvable:$true] %s126_s27 }
  0x39   :  { %v104_v4 = vsub.f32 %v100_v0, %v102_v2  ;;  %v105_v5 = vsub.f32 %v101_v1, %v103_v3  ;;  %v108_v6 = vld [vmem:[#allocation2] sm:$0xff]  ;;  %v109_v8 = vld [vmem:[#allocation2 + $0x8] sm:$0xff]  ;;  %s230_s28 = scalar_lea.vmem %s137_s26, 128  ;;  %p235_p11 = scmp.lt.s32.totalorder %s137_s26, %s137_s26 }
  0x3a   :  { %p231_p10 = scmp.ne.s32.totalorder %s137_s26, %s230_s28  ;;  %p236_p12 = scmp.lt.s32.totalorder %s230_s28, %s230_s28 }
  0x3b   :  { %v106_v7 = vand.u32 2147483647, %v104_v4  ;;  %v107_v9 = vand.u32 2147483647, %v105_v5 }
  0x3c   :  { %p237_p13 = por %p236_p12, %p235_p11 }
  0x3d   :  { %v110_v10 = vmul.f32 %v108_v6, %v106_v7  ;;  %v113_v11 = vadd.f32 %v107_v9, %v106_v7  ;;  %v111_v12 = vmul.f32 %v109_v8, %v107_v9 }
  0x3e   :  { %p238_p0 = pnand %p237_p13, %p231_p10 }
  0x3f   :  { %v117_v13 = vadd.f32 %v111_v12, %v110_v10  ;;  %115 = vst [vmem:[#allocation9] sm:$0xff] %v113_v11 }
  0x40   :  { %241 = shalt.err (!%p238_p0)
}
  0x41   :  { %s242_s5 = scalar_lea.hbm %s394_s4, 128 }
  0x42   :  { %p243_p1 = scmp.ne.s32.totalorder %s394_s4, %s242_s5  ;;  %p246_p2 = scmp.lt.u32.totalorder %s242_s5, %s394_s4 }
  0x44   :  { %p248_p3 = pnand %p246_p2, %p243_p1 }
  0x46   :  { %251 = shalt.err (!%p248_p3)
}
  0x47   :  { %139 = dma.vmem_to_hbm [thread:$0]  %s137_s26, 128, %s394_s4, [#allocation10]   ;;  %119 = vst [vmem:[#allocation8] sm:$0xff] %v117_v13 }
  0x48   :  { %s252_s12 = scalar_lea.vmem %s127_s27, 128  ;;  %p257_p5 = scmp.lt.s32.totalorder %s127_s27, %s127_s27 }
  0x49   :  { %p253_p4 = scmp.ne.s32.totalorder %s127_s27, %s252_s12  ;;  %p258_p6 = scmp.lt.s32.totalorder %s252_s12, %s252_s12 }
  0x4b   :  { %p259_p7 = por %p258_p6, %p257_p5 }
  0x4d   :  { %p260_p8 = pnand %p259_p7, %p253_p4 }
  0x4f   :  { %263 = shalt.err (!%p260_p8)
}
  0x50   :  { %s264_s14 = scalar_lea.hbm %s393_s3, 128 }
  0x51   :  { %p265_p9 = scmp.ne.s32.totalorder %s393_s3, %s264_s14  ;;  %p268_p10 = scmp.lt.u32.totalorder %s264_s14, %s393_s3 }
  0x53   :  { %p270_p11 = pnand %p268_p10, %p265_p9 }
  0x55   :  { %273 = shalt.err (!%p270_p11)
}
  0x56   :  { %129 = dma.vmem_to_hbm [thread:$0]  %s127_s27, 128, %s393_s3, [#allocation4]  }
  0x57   :  { %278 = dma.done.wait [#allocation4], 128  }
  0x58   :  { %279 = vsyncadd [#allocation4], 4294967168 }
  0x59   :  { %280 = dma.done.wait [#allocation10], 128  }
  0x5a   :  { %281 = vsyncadd [#allocation10], 4294967168 }
  0x5b   :  { %146 = vsyncpa [#allocation3], 1 }
  0x5c   :  { %147 = vsyncpa [#allocation6], 1 }
  0x5d   :  { %148 = vsyncpa [#allocation4], 1 }
  0x5e   :  { %149 = vsyncpa [#allocation10], 1 }

</bundles_post_ra>
